<compile_context>
chip_gen: v5e
topology: v5e:2x2
jax: 0.10.0
libtpu: 0.0.40
codegen_flags: <defaults>
</compile_context>

<pallas_src>
import functools

import jax
import jax.numpy as jnp
from jax.experimental import pallas as pl
from jax.experimental.pallas import tpu as pltpu

IN_DIM = 784
HID_DIM = 256
OUT_DIM = 10
OUT_PAD = 128          # lane-dense output width (cols 10..127 are zeros)
TB_DEFAULT = 1024      # batch tile (rows); multiple of 8, VMEM-safe on all gens


def _round_up(x, m):
    return ((x + m - 1) // m) * m


def mlp_kernel(x_ref, w1_ref, b1_ref, w2_ref, b2_ref, o_ref):
    # Hidden layer: (TB, 784) bf16 @ (784, 256) bf16 -> f32 accumulate on MXU.
    h = jnp.dot(x_ref[...], w1_ref[...], preferred_element_type=jnp.float32)
    a = jnp.maximum(h + b1_ref[...], 0.0)                 # bias + ReLU on VPU
    # Output layer: (TB, 256) bf16 @ (256, 128) bf16 -> f32 accumulate.
    out = jnp.dot(a.astype(w2_ref.dtype), w2_ref[...],
                  preferred_element_type=jnp.float32)
    o_ref[...] = (out + b2_ref[...]).astype(o_ref.dtype)  # lane-dense store


@jax.jit
def mlp_forward(x, w1, b1, w2, b2):
    """x: (B, 784) f32.  w1: (784,256), b1: (1,256), w2: (256,10), b2: (1,10)."""
    B = x.shape[0]
    TB = min(TB_DEFAULT, _round_up(B, 8))
    B_pad = _round_up(B, TB)

    # Pad ragged batch in the wrapper so every grid step is a full tile.
    if B_pad != B:
        x = jnp.pad(x, ((0, B_pad - B), (0, 0)))

    # Cast matmul operands to bf16 once (f32 accumulation happens in-kernel).
    x_bf = x.astype(jnp.bfloat16)
    w1_bf = w1.astype(jnp.bfloat16)

    # Lane-dense output: zero-pad W2/b2 from 10 -> 128 columns.
    w2_bf = jnp.zeros((HID_DIM, OUT_PAD), jnp.bfloat16)
    w2_bf = w2_bf.at[:, :OUT_DIM].set(w2.astype(jnp.bfloat16))
    b2_p = jnp.zeros((1, OUT_PAD), jnp.float32).at[:, :OUT_DIM].set(b2)
    b1_f = b1.astype(jnp.float32)

    grid = (B_pad // TB,)
    flops = 2 * B_pad * (IN_DIM * HID_DIM + HID_DIM * OUT_PAD)
    bytes_accessed = (
        B_pad * IN_DIM * 2                 # x stream (bf16)
        + IN_DIM * HID_DIM * 2             # W1 (bf16)
        + HID_DIM * OUT_PAD * 2            # W2 (bf16, padded)
        + HID_DIM * 4 + OUT_PAD * 4        # biases (f32)
        + B_pad * OUT_PAD * 4              # output (f32)
    )

    out = pl.pallas_call(
        mlp_kernel,
        out_shape=jax.ShapeDtypeStruct((B_pad, OUT_PAD), jnp.float32),
        grid_spec=pltpu.PrefetchScalarGridSpec(
            num_scalar_prefetch=0,
            grid=grid,
            in_specs=[
                pl.BlockSpec((TB, IN_DIM), lambda i: (i, 0)),        # x: tiled
                pl.BlockSpec((IN_DIM, HID_DIM), lambda i: (0, 0)),   # W1: resident
                pl.BlockSpec((1, HID_DIM), lambda i: (0, 0)),        # b1: resident
                pl.BlockSpec((HID_DIM, OUT_PAD), lambda i: (0, 0)),  # W2: resident
                pl.BlockSpec((1, OUT_PAD), lambda i: (0, 0)),        # b2: resident
            ],
            out_specs=pl.BlockSpec((TB, OUT_PAD), lambda i: (i, 0)),
        ),
        compiler_params=pltpu.CompilerParams(
            dimension_semantics=("parallel",)),
        cost_estimate=pl.CostEstimate(
            flops=flops, transcendentals=0, bytes_accessed=bytes_accessed),
    )(x_bf, w1_bf, b1_f, w2_bf, b2_p)

    # Strip batch padding and the 118 zero output lanes.
    return out[:B, :OUT_DIM]


def init_params(key):
    # Deterministic init mimicking nn.Linear default: U(-1/sqrt(fan_in), 1/sqrt(fan_in)).
    k1, k2, k3, k4 = jax.random.split(key, 4)
    bound1 = 1.0 / jnp.sqrt(IN_DIM)
    bound2 = 1.0 / jnp.sqrt(HID_DIM)
    # Stored pre-transposed: (in, out) so the kernel does x @ W directly.
    w1 = jax.random.uniform(k1, (IN_DIM, HID_DIM), jnp.float32, -bound1, bound1)
    b1 = jax.random.uniform(k2, (1, HID_DIM), jnp.float32, -bound1, bound1)
    w2 = jax.random.uniform(k3, (HID_DIM, OUT_DIM), jnp.float32, -bound2, bound2)
    b2 = jax.random.uniform(k4, (1, OUT_DIM), jnp.float32, -bound2, bound2)
    return w1, b1, w2, b2


if __name__ == "__main__":
    key = jax.random.PRNGKey(0)
    kx, kp = jax.random.split(key)
    B = 8
    x = jax.random.normal(kx, (B, IN_DIM), jnp.float32)
    w1, b1, w2, b2 = init_params(kp)

    out = mlp_forward(x, w1, b1, w2, b2)
    out = jax.block_until_ready(out)

    # Pure-JAX f32 reference; looser tolerance because matmul inputs are bf16.
    ref = jnp.maximum(x @ w1 + b1, 0.0) @ w2 + b2
    assert out.shape == (B, OUT_DIM)
    assert jnp.allclose(out, ref, atol=2e-2, rtol=2e-2), (
        float(jnp.max(jnp.abs(out - ref))))

    print("KERNEL_OK")
</pallas_src>

<mosaic_0001>
module attributes {stable_mosaic.version = 11 : i64} {
  func.func @mlp_kernel(%arg0: i32, %arg1: memref<8x784xbf16, #tpu.memory_space<vmem>>, %arg2: memref<784x256xbf16, #tpu.memory_space<vmem>>, %arg3: memref<1x256xf32, #tpu.memory_space<vmem>>, %arg4: memref<256x128xbf16, #tpu.memory_space<vmem>>, %arg5: memref<1x128xf32, #tpu.memory_space<vmem>>, %arg6: memref<8x128xf32, #tpu.memory_space<vmem>>) attributes {dimension_semantics = [#tpu.dimension_semantics<parallel>], iteration_bounds = array<i64: 1>, scalar_prefetch = 0 : i64, scratch_operands = 0 : i64, tpu.core_type = #tpu.core_type<tc>, window_params = [{transform_indices = @transform_0, window_bounds = array<i64: 8, 784>}, {pipeline_mode = #tpu.pipeline_mode<synchronous>, transform_indices = @transform_1, window_bounds = array<i64: 784, 256>}, {pipeline_mode = #tpu.pipeline_mode<synchronous>, transform_indices = @transform_2, window_bounds = array<i64: 1, 256>}, {pipeline_mode = #tpu.pipeline_mode<synchronous>, transform_indices = @transform_3, window_bounds = array<i64: 256, 128>}, {pipeline_mode = #tpu.pipeline_mode<synchronous>, transform_indices = @transform_4, window_bounds = array<i64: 1, 128>}, {transform_indices = @transform_5, window_bounds = array<i64: 8, 128>}]} {
    %c0 = arith.constant 0 : index
    %c0_0 = arith.constant 0 : index
    %0 = vector.load %arg1[%c0, %c0_0] : memref<8x784xbf16, #tpu.memory_space<vmem>>, vector<8x784xbf16>
    %c0_1 = arith.constant 0 : index
    %c0_2 = arith.constant 0 : index
    %1 = vector.load %arg2[%c0_1, %c0_2] : memref<784x256xbf16, #tpu.memory_space<vmem>>, vector<784x256xbf16>
    %cst = arith.constant dense<0.000000e+00> : vector<8x256xf32>
    %2 = tpu.matmul %0, %1, %cst {dimension_numbers = #tpu.dot_dimension_numbers<[1], [0], [0], [1], [0, 0, 1, 1], [], []>} : vector<8x784xbf16>, vector<784x256xbf16>, vector<8x256xf32> -> vector<8x256xf32>
    %c0_3 = arith.constant 0 : index
    %c0_4 = arith.constant 0 : index
    %3 = vector.load %arg3[%c0_3, %c0_4] : memref<1x256xf32, #tpu.memory_space<vmem>>, vector<1x256xf32>
    %4 = vector.broadcast %3 : vector<1x256xf32> to vector<8x256xf32>
    %5 = arith.addf %2, %4 : vector<8x256xf32>
    %cst_5 = arith.constant 0.000000e+00 : f32
    %6 = vector.broadcast %cst_5 : f32 to vector<8x256xf32>
    %7 = arith.maximumf %5, %6 : vector<8x256xf32>
    %8 = arith.truncf %7 : vector<8x256xf32> to vector<8x256xbf16>
    %c0_6 = arith.constant 0 : index
    %c0_7 = arith.constant 0 : index
    %9 = vector.load %arg4[%c0_6, %c0_7] : memref<256x128xbf16, #tpu.memory_space<vmem>>, vector<256x128xbf16>
    %cst_8 = arith.constant dense<0.000000e+00> : vector<8x128xf32>
    %10 = tpu.matmul %8, %9, %cst_8 {dimension_numbers = #tpu.dot_dimension_numbers<[1], [0], [0], [1], [0, 0, 1, 1], [], []>} : vector<8x256xbf16>, vector<256x128xbf16>, vector<8x128xf32> -> vector<8x128xf32>
    %c0_9 = arith.constant 0 : index
    %c0_10 = arith.constant 0 : index
    %11 = vector.load %arg5[%c0_9, %c0_10] : memref<1x128xf32, #tpu.memory_space<vmem>>, vector<1x128xf32>
    %12 = vector.broadcast %11 : vector<1x128xf32> to vector<8x128xf32>
    %13 = arith.addf %10, %12 : vector<8x128xf32>
    %c0_11 = arith.constant 0 : index
    %c0_12 = arith.constant 0 : index
    %14 = vector.load %arg6[%c0_11, %c0_12] : memref<8x128xf32, #tpu.memory_space<vmem>>, vector<8x128xf32>
    tpu.vector_store %arg6[%c0_11, %c0_12], %13 {strides = array<i32>} : memref<8x128xf32, #tpu.memory_space<vmem>>, vector<8x128xf32>,
    return
  }
  func.func @transform_0(%arg0: i32) -> (i32, i32) {
    %c0_i32 = arith.constant 0 : i32
    %c0_i32_0 = arith.constant 0 : i32
    return %arg0, %c0_i32 : i32, i32
  }
  func.func @transform_1(%arg0: i32) -> (i32, i32) {
    %c0_i32 = arith.constant 0 : i32
    %c0_i32_0 = arith.constant 0 : i32
    %c0_i32_1 = arith.constant 0 : i32
    return %c0_i32, %c0_i32_0 : i32, i32
  }
  func.func @transform_2(%arg0: i32) -> (i32, i32) {
    %c0_i32 = arith.constant 0 : i32
    %c0_i32_0 = arith.constant 0 : i32
    %c0_i32_1 = arith.constant 0 : i32
    return %c0_i32, %c0_i32_0 : i32, i32
  }
  func.func @transform_3(%arg0: i32) -> (i32, i32) {
    %c0_i32 = arith.constant 0 : i32
    %c0_i32_0 = arith.constant 0 : i32
    %c0_i32_1 = arith.constant 0 : i32
    return %c0_i32, %c0_i32_0 : i32, i32
  }
  func.func @transform_4(%arg0: i32) -> (i32, i32) {
    %c0_i32 = arith.constant 0 : i32
    %c0_i32_0 = arith.constant 0 : i32
    %c0_i32_1 = arith.constant 0 : i32
    return %c0_i32, %c0_i32_0 : i32, i32
  }
  func.func @transform_5(%arg0: i32) -> (i32, i32) {
    %c0_i32 = arith.constant 0 : i32
    %c0_i32_0 = arith.constant 0 : i32
    return %arg0, %c0_i32 : i32, i32
  }
}

</mosaic_0001>

<bundles_post_ra>
// kernel: mlp_forward.1
= control target key start
LH: loop header
LB: loop body
LE: loop exit
PB: predicated region body
PF: predicated region fallthrough
CT: control target
= control target key end

     0   :  { %vm644_vm0 = vcmask 130048   ;;  %s2327_s0 = inlined_call_operand.vmem [shape: bf16[8,784], index: 0, kind: input, shape index: {}]   ;;  %s2328_s1 = inlined_call_operand.vmem [shape: bf16[784,256], index: 1, kind: input, shape index: {}]   ;;  %s2329_s2 = inlined_call_operand.vmem [shape: f32[1,256], index: 2, kind: input, shape index: {}]   ;;  %s2330_s3 = inlined_call_operand.vmem [shape: bf16[256,128], index: 3, kind: input, shape index: {}]   ;;  %s2331_s4 = inlined_call_operand.vmem [shape: f32[1,128], index: 4, kind: input, shape index: {}]   ;;  %s2332_s5 = inlined_call_operand.hbm [shape: f32[8,128], index: 5, kind: output, shape index: {}]  }
   0x1   :  { %v1067_v0 = vld [vmem:[%s2328_s1 + $0x70] sm:$0xf]  ;;  %v1482_v1 = vld [vmem:[%s2328_s1 + $0x74] sm:$0xf0]  ;;  %v1059_v11 = vld [vmem:[%s2328_s1 + $0x60] sm:$0xf] }
   0x2   :  { %v1195_v2 = vld [vmem:[%s2328_s1 + $0x170] sm:$0xf]  ;;  %v1068_v3 = vor.u32 %v1482_v1, %v1067_v0  ;;  %v1514_v4 = vld [vmem:[%s2328_s1 + $0x174] sm:$0xf0]  ;;  %v1480_v13 = vld [vmem:[%s2328_s1 + $0x64] sm:$0xf0] }
   0x3   :  { %v1259_v5 = vld [vmem:[%s2328_s1 + $0x1f0] sm:$0xf]  ;;  %v1530_v6 = vld [vmem:[%s2328_s1 + $0x1f4] sm:$0xf0]  ;;  %v1196_v7 = vor.u32 %v1514_v4, %v1195_v2  ;;  %v1187_v14 = vld [vmem:[%s2328_s1 + $0x160] sm:$0xf]  ;;  %v1060_v16 = vor.u32 %v1480_v13, %v1059_v11 }
   0x4   :  { %v1260_v8 = vor.u32 %v1530_v6, %v1259_v5  ;;  %v1131_v9 = vld [vmem:[%s2328_s1 + $0xf0] sm:$0xf]  ;;  %v1498_v10 = vld [vmem:[%s2328_s1 + $0xf4] sm:$0xf0]  ;;  %648 = vmatpush.bf16.msra.mxu0 %v1068_v3  ;;  %v1512_v15 = vld [vmem:[%s2328_s1 + $0x164] sm:$0xf0] }
   0x5   :  { %v1132_v12 = vor.u32 %v1498_v10, %v1131_v9  ;;  %674 = vmatpush.bf16.msra.mxu2 %v1196_v7  ;;  %v1188_v17 = vor.u32 %v1512_v15, %v1187_v14  ;;  %v1251_v18 = vld [vmem:[%s2328_s1 + $0x1e0] sm:$0xf]  ;;  %v1528_v19 = vld [vmem:[%s2328_s1 + $0x1e4] sm:$0xf0]  ;;  %v1051_v23 = vld [vmem:[%s2328_s1 + $0x50] sm:$0xf] }
   0x6   :  { %687 = vmatpush.bf16.msra.mxu3 %v1260_v8  ;;  %v1123_v20 = vld [vmem:[%s2328_s1 + $0xe0] sm:$0xf]  ;;  %v1252_v21 = vor.u32 %v1528_v19, %v1251_v18  ;;  %v1496_v22 = vld [vmem:[%s2328_s1 + $0xe4] sm:$0xf0]  ;;  %v1478_v24 = vld [vmem:[%s2328_s1 + $0x54] sm:$0xf0] }
   0x7   :  { %661 = vmatpush.bf16.msra.mxu1 %v1132_v12  ;;  %v1124_v25 = vor.u32 %v1496_v22, %v1123_v20  ;;  %v1179_v26 = vld [vmem:[%s2328_s1 + $0x150] sm:$0xf]  ;;  %v1510_v27 = vld [vmem:[%s2328_s1 + $0x154] sm:$0xf0]  ;;  %v1052_v29 = vor.u32 %v1478_v24, %v1051_v23  ;;  %v1043_v35 = vld [vmem:[%s2328_s1 + $0x40] sm:$0xf] }
   0x8   :  { %v1243_v28 = vld [vmem:[%s2328_s1 + $0x1d0] sm:$0xf]  ;;  %649 = vmatpush.bf16.msra.mxu0 %v1060_v16  ;;  %v1526_v30 = vld [vmem:[%s2328_s1 + $0x1d4] sm:$0xf0]  ;;  %v1180_v33 = vor.u32 %v1510_v27, %v1179_v26  ;;  %v1476_v36 = vld [vmem:[%s2328_s1 + $0x44] sm:$0xf0] }
   0x9   :  { %v1115_v31 = vld [vmem:[%s2328_s1 + $0xd0] sm:$0xf]  ;;  %v1494_v32 = vld [vmem:[%s2328_s1 + $0xd4] sm:$0xf0]  ;;  %675 = vmatpush.bf16.msra.mxu2 %v1188_v17  ;;  %v1244_v34 = vor.u32 %v1526_v30, %v1243_v28  ;;  %v1171_v37 = vld [vmem:[%s2328_s1 + $0x140] sm:$0xf]  ;;  %v1044_v44 = vor.u32 %v1476_v36, %v1043_v35 }
   0xa   :  { %688 = vmatpush.bf16.msra.mxu3 %v1252_v21  ;;  %v1116_v38 = vor.u32 %v1494_v32, %v1115_v31  ;;  %v1508_v39 = vld [vmem:[%s2328_s1 + $0x144] sm:$0xf0]  ;;  %v1235_v40 = vld [vmem:[%s2328_s1 + $0x1c0] sm:$0xf]  ;;  %v1035_v47 = vld [vmem:[%s2328_s1 + $0x30] sm:$0xf] }
   0xb   :  { %662 = vmatpush.bf16.msra.mxu1 %v1124_v25  ;;  %v1524_v41 = vld [vmem:[%s2328_s1 + $0x1c4] sm:$0xf0]  ;;  %v1107_v42 = vld [vmem:[%s2328_s1 + $0xc0] sm:$0xf]  ;;  %v1172_v45 = vor.u32 %v1508_v39, %v1171_v37  ;;  %v1474_v48 = vld [vmem:[%s2328_s1 + $0x34] sm:$0xf0] }
   0xc   :  { %v1492_v43 = vld [vmem:[%s2328_s1 + $0xc4] sm:$0xf0]  ;;  %650 = vmatpush.bf16.msra.mxu0 %v1052_v29  ;;  %v1236_v46 = vor.u32 %v1524_v41, %v1235_v40  ;;  %v1163_v49 = vld [vmem:[%s2328_s1 + $0x130] sm:$0xf]  ;;  %v1506_v51 = vld [vmem:[%s2328_s1 + $0x134] sm:$0xf0]  ;;  %v1036_v56 = vor.u32 %v1474_v48, %v1035_v47 }
   0xd   :  { %676 = vmatpush.bf16.msra.mxu2 %v1180_v33  ;;  %v1108_v50 = vor.u32 %v1492_v43, %v1107_v42  ;;  %v1227_v52 = vld [vmem:[%s2328_s1 + $0x1b0] sm:$0xf]  ;;  %v1522_v53 = vld [vmem:[%s2328_s1 + $0x1b4] sm:$0xf0]  ;;  %v1164_v57 = vor.u32 %v1506_v51, %v1163_v49  ;;  %v1027_v59 = vld [vmem:[%s2328_s1 + $0x20] sm:$0xf] }
   0xe   :  { %689 = vmatpush.bf16.msra.mxu3 %v1244_v34  ;;  %v1099_v54 = vld [vmem:[%s2328_s1 + $0xb0] sm:$0xf]  ;;  %v1490_v55 = vld [vmem:[%s2328_s1 + $0xb4] sm:$0xf0]  ;;  %v1228_v58 = vor.u32 %v1522_v53, %v1227_v52  ;;  %v1472_v60 = vld [vmem:[%s2328_s1 + $0x24] sm:$0xf0] }
   0xf   :  { %663 = vmatpush.bf16.msra.mxu1 %v1116_v38  ;;  %v1155_v61 = vld [vmem:[%s2328_s1 + $0x120] sm:$0xf]  ;;  %v1100_v62 = vor.u32 %v1490_v55, %v1099_v54  ;;  %v1504_v63 = vld [vmem:[%s2328_s1 + $0x124] sm:$0xf0]  ;;  %v1028_v4 = vor.u32 %v1472_v60, %v1027_v59  ;;  %v1019_v7 = vld [vmem:[%s2328_s1 + $0x10] sm:$0xf] }
  0x10   :  { %651 = vmatpush.bf16.msra.mxu0 %v1044_v44  ;;  %v1219_v0 = vld [vmem:[%s2328_s1 + $0x1a0] sm:$0xf]  ;;  %v1520_v1 = vld [vmem:[%s2328_s1 + $0x1a4] sm:$0xf0]  ;;  %v1156_v5 = vor.u32 %v1504_v63, %v1155_v61  ;;  %v1470_v8 = vld [vmem:[%s2328_s1 + $0x14] sm:$0xf0] }
  0x11   :  { %677 = vmatpush.bf16.msra.mxu2 %v1172_v45  ;;  %v1091_v2 = vld [vmem:[%s2328_s1 + $0xa0] sm:$0xf]  ;;  %v1488_v3 = vld [vmem:[%s2328_s1 + $0xa4] sm:$0xf0]  ;;  %v1220_v6 = vor.u32 %v1520_v1, %v1219_v0  ;;  %v1147_v9 = vld [vmem:[%s2328_s1 + $0x110] sm:$0xf]  ;;  %v1020_v17 = vor.u32 %v1470_v8, %v1019_v7 }
  0x12   :  { %690 = vmatpush.bf16.msra.mxu3 %v1236_v46  ;;  %v1092_v10 = vor.u32 %v1488_v3, %v1091_v2  ;;  %v1502_v11 = vld [vmem:[%s2328_s1 + $0x114] sm:$0xf0]  ;;  %v1211_v12 = vld [vmem:[%s2328_s1 + $0x190] sm:$0xf]  ;;  %v1011_v16 = vld [vmem:[%s2328_s1] sm:$0xf] }
  0x13   :  { %664 = vmatpush.bf16.msra.mxu1 %v1108_v50  ;;  %v1518_v13 = vld [vmem:[%s2328_s1 + $0x194] sm:$0xf0]  ;;  %v1083_v14 = vld [vmem:[%s2328_s1 + $0x90] sm:$0xf]  ;;  %v1468_v18 = vld [vmem:[%s2328_s1 + $0x4] sm:$0xf0]  ;;  %v1148_v21 = vor.u32 %v1502_v11, %v1147_v9 }
  0x14   :  { %652 = vmatpush.bf16.msra.mxu0 %v1036_v56  ;;  %v1486_v15 = vld [vmem:[%s2328_s1 + $0x94] sm:$0xf0]  ;;  %v1139_v19 = vld [vmem:[%s2328_s1 + $0x100] sm:$0xf]  ;;  %v1500_v20 = vld [vmem:[%s2328_s1 + $0x104] sm:$0xf0]  ;;  %v1212_v22 = vor.u32 %v1518_v13, %v1211_v12  ;;  %v1012_v33 = vor.u32 %v1468_v18, %v1011_v16 }
  0x15   :  { %678 = vmatpush.bf16.msra.mxu2 %v1164_v57  ;;  %v1203_v23 = vld [vmem:[%s2328_s1 + $0x180] sm:$0xf]  ;;  %v1516_v24 = vld [vmem:[%s2328_s1 + $0x184] sm:$0xf0]  ;;  %v1084_v26 = vor.u32 %v1486_v15, %v1083_v14  ;;  %v1323_v27 = vld [vmem:[%s2328_s1 + $0x270] sm:$0xf]  ;;  %v1140_v37 = vor.u32 %v1500_v20, %v1139_v19 }
  0x16   :  { %691 = vmatpush.bf16.msra.mxu3 %v1228_v58  ;;  %v23_v25 = vld [vmem:[%s2327_s0 + $0x8] sm:$0xff]  ;;  %v1546_v28 = vld [vmem:[%s2328_s1 + $0x274] sm:$0xf0]  ;;  %v1481_v29 = vld [vmem:[%s2328_s1 + $0x74] sm:$0xf]  ;;  %v1204_v38 = vor.u32 %v1516_v24, %v1203_v23 }
  0x17   :  { %665 = vmatpush.bf16.msra.mxu1 %v1100_v62  ;;  %v1069_v30 = vld [vmem:[%s2328_s1 + $0x78] sm:$0xf0]  ;;  %v1075_v31 = vld [vmem:[%s2328_s1 + $0x80] sm:$0xf]  ;;  %v1484_v32 = vld [vmem:[%s2328_s1 + $0x84] sm:$0xf0]  ;;  %v136_v34 = vunpack.c.l.b16 %v23_v25  ;;  %v1324_v42 = vor.u32 %v1546_v28, %v1323_v27  ;;  %v137_v53 = vunpack.c.h.b16 %v23_v25 }
  0x18   :  { %653 = vmatpush.bf16.msra.mxu0 %v1028_v4  ;;  %v1395_v35 = vld [vmem:[%s2328_s1 + $0x300] sm:$0xf]  ;;  %v1564_v36 = vld [vmem:[%s2328_s1 + $0x304] sm:$0xf0]  ;;  %v1387_v39 = vld [vmem:[%s2328_s1 + $0x2f0] sm:$0xf]  ;;  %v1072_v43 = vor.u32 %v1481_v29, %v1069_v30  ;;  %v1076_v44 = vor.u32 %v1484_v32, %v1075_v31 }
  0x19   :  { %679 = vmatpush.bf16.msra.mxu2 %v1156_v5  ;;  %v1562_v40 = vld [vmem:[%s2328_s1 + $0x2f4] sm:$0xf0]  ;;  %v1497_v41 = vld [vmem:[%s2328_s1 + $0xf4] sm:$0xf]  ;;  %v1133_v45 = vld [vmem:[%s2328_s1 + $0xf8] sm:$0xf0]  ;;  %v1396_v48 = vor.u32 %v1564_v36, %v1395_v35  ;;  %v1880_v55 = vpack.c.b16 %v136_v34, %v136_v34  ;;  %v1908_v5 = vpack.c.b16 %v137_v53, %v137_v53 }
  0x1a   :  { %692 = vmatpush.bf16.msra.mxu3 %v1220_v6  ;;  %v1315_v46 = vld [vmem:[%s2328_s1 + $0x260] sm:$0xf]  ;;  %v1544_v49 = vld [vmem:[%s2328_s1 + $0x264] sm:$0xf0]  ;;  %v1479_v50 = vld [vmem:[%s2328_s1 + $0x64] sm:$0xf]  ;;  %v1388_v56 = vor.u32 %v1562_v40, %v1387_v39  ;;  %v1136_v57 = vor.u32 %v1497_v41, %v1133_v45 }
  0x1b   :  { %666 = vmatpush.bf16.msra.mxu1 %v1092_v10  ;;  %v22_v47 = vld [vmem:[%s2327_s0] sm:$0xff]  ;;  %v1061_v51 = vld [vmem:[%s2328_s1 + $0x68] sm:$0xf0]  ;;  %v1560_v59 = vld [vmem:[%s2328_s1 + $0x2e4] sm:$0xf0]  ;;  %v1316_v61 = vor.u32 %v1544_v49, %v1315_v46 }
  0x1c   :  { %654 = vmatpush.bf16.msra.mxu0 %v1020_v17  ;;  %v134_v52 = vunpack.c.l.b16 %v22_v47  ;;  %v135_v54 = vunpack.c.h.b16 %v22_v47  ;;  %v1379_v58 = vld [vmem:[%s2328_s1 + $0x2e0] sm:$0xf]  ;;  %v1064_v62 = vor.u32 %v1479_v50, %v1061_v51  ;;  %v1495_v63 = vld [vmem:[%s2328_s1 + $0xe4] sm:$0xf]  ;;  %v1125_v0 = vld [vmem:[%s2328_s1 + $0xe8] sm:$0xf0] }
  0x1d   :  { %680 = vmatpush.bf16.msra.mxu2 %v1148_v21  ;;  %v1307_v1 = vld [vmem:[%s2328_s1 + $0x250] sm:$0xf]  ;;  %v1542_v2 = vld [vmem:[%s2328_s1 + $0x254] sm:$0xf0]  ;;  %v1477_v3 = vld [vmem:[%s2328_s1 + $0x54] sm:$0xf]  ;;  %v1380_v7 = vor.u32 %v1560_v59, %v1379_v58  ;;  %v1128_v8 = vor.u32 %v1495_v63, %v1125_v0 }
  0x1e   :  { %693 = vmatpush.bf16.msra.mxu3 %v1212_v22  ;;  %v1888_v60 = vpack.c.b16 %v134_v52, %v134_v52  ;;  %v1053_v4 = vld [vmem:[%s2328_s1 + $0x58] sm:$0xf0]  ;;  %v1910_v6 = vpack.c.b16 %v135_v54, %v135_v54  ;;  %v1371_v9 = vld [vmem:[%s2328_s1 + $0x2d0] sm:$0xf]  ;;  %v1558_v10 = vld [vmem:[%s2328_s1 + $0x2d4] sm:$0xf0]  ;;  %v1308_v11 = vor.u32 %v1542_v2, %v1307_v1 }
  0x1f   :  { %667 = vmatpush.bf16.msra.mxu1 %v1084_v26  ;;  %v1056_v12 = vor.u32 %v1477_v3, %v1053_v4  ;;  %v1493_v13 = vld [vmem:[%s2328_s1 + $0xd4] sm:$0xf]  ;;  %v1117_v14 = vld [vmem:[%s2328_s1 + $0xd8] sm:$0xf0]  ;;  %v1299_v15 = vld [vmem:[%s2328_s1 + $0x240] sm:$0xf]  ;;  %v1372_v19 = vor.u32 %v1558_v10, %v1371_v9 }
  0x20   :  { %655 = vmatpush.bf16.msra.mxu0 %v1012_v33  ;;  %v1540_v16 = vld [vmem:[%s2328_s1 + $0x244] sm:$0xf0]  ;;  %v1475_v17 = vld [vmem:[%s2328_s1 + $0x44] sm:$0xf]  ;;  %v1045_v18 = vld [vmem:[%s2328_s1 + $0x48] sm:$0xf0]  ;;  %v1120_v20 = vor.u32 %v1493_v13, %v1117_v14 }
  0x21   :  { %681 = vmatpush.bf16.msra.mxu2 %v1140_v37  ;;  %v1363_v21 = vld [vmem:[%s2328_s1 + $0x2c0] sm:$0xf]  ;;  %v1556_v22 = vld [vmem:[%s2328_s1 + $0x2c4] sm:$0xf0]  ;;  %v1491_v23 = vld [vmem:[%s2328_s1 + $0xc4] sm:$0xf]  ;;  %v1300_v24 = vor.u32 %v1540_v16, %v1299_v15  ;;  %v1048_v25 = vor.u32 %v1475_v17, %v1045_v18 }
  0x22   :  { %694 = vmatpush.bf16.msra.mxu3 %v1204_v38  ;;  %v1109_v26 = vld [vmem:[%s2328_s1 + $0xc8] sm:$0xf0]  ;;  %v1291_v27 = vld [vmem:[%s2328_s1 + $0x230] sm:$0xf]  ;;  %v1538_v28 = vld [vmem:[%s2328_s1 + $0x234] sm:$0xf0]  ;;  %v1364_v32 = vor.u32 %v1556_v22, %v1363_v21 }
  0x23   :  { %668 = vmatpush.bf16.msra.mxu1 %v1076_v44  ;;  %656 = vmatmul.bf16.vlgmr.msra.gmra.mxu0 %v1888_v60  ;;  %v1473_v29 = vld [vmem:[%s2328_s1 + $0x34] sm:$0xf]  ;;  %v1037_v30 = vld [vmem:[%s2328_s1 + $0x38] sm:$0xf0]  ;;  %v25_v31 = vld [vmem:[%s2327_s0 + $0x18] sm:$0xf]  ;;  %v1112_v34 = vor.u32 %v1491_v23, %v1109_v26  ;;  %v1292_v37 = vor.u32 %v1538_v28, %v1291_v27 }
  0x24   :  { %700 = vmatpush.bf16.msrb.mxu0 %v1324_v42  ;;  %682 = vmatmul.bf16.vlgmr.msra.gmra.mxu2 %v1880_v55  ;;  %v140_v33 = vunpack.c.l.b16 %v25_v31  ;;  %v1355_v35 = vld [vmem:[%s2328_s1 + $0x2b0] sm:$0xf]  ;;  %v1554_v36 = vld [vmem:[%s2328_s1 + $0x2b4] sm:$0xf0]  ;;  %v1040_v38 = vor.u32 %v1473_v29, %v1037_v30  ;;  %v1489_v39 = vld [vmem:[%s2328_s1 + $0xb4] sm:$0xf] }
  0x25   :  { %733 = vmatpush.bf16.msrb.mxu2 %v1396_v48  ;;  %695 = vmatmul.bf16.vlgmr.msra.gmra.mxu3 %v1908_v5  ;;  %v1101_v40 = vld [vmem:[%s2328_s1 + $0xb8] sm:$0xf0]  ;;  %v1283_v41 = vld [vmem:[%s2328_s1 + $0x220] sm:$0xf]  ;;  %v1536_v42 = vld [vmem:[%s2328_s1 + $0x224] sm:$0xf0]  ;;  %v1356_v45 = vor.u32 %v1554_v36, %v1355_v35 }
  0x26   :  { %739 = vmatpush.bf16.msrb.mxu3 %v1072_v43  ;;  %669 = vmatmul.bf16.vlgmr.msra.gmra.mxu1 %v1910_v6  ;;  %v1471_v43 = vld [vmem:[%s2328_s1 + $0x24] sm:$0xf]  ;;  %v1029_v44 = vld [vmem:[%s2328_s1 + $0x28] sm:$0xf0]  ;;  %v1991_v46 = vpack.c.b16 %v140_v33, %v140_v33  ;;  %v1104_v47 = vor.u32 %v1489_v39, %v1101_v40  ;;  %v1347_v48 = vld [vmem:[%s2328_s1 + $0x2a0] sm:$0xf]  ;;  %v1284_v50 = vor.u32 %v1536_v42, %v1283_v41 }
  0x27   :  { %713 = vmatpush.bf16.msrb.mxu1 %v1388_v56  ;;  %v1552_v49 = vld [vmem:[%s2328_s1 + $0x2a4] sm:$0xf0]  ;;  %v1032_v51 = vor.u32 %v1471_v43, %v1029_v44  ;;  %v1487_v52 = vld [vmem:[%s2328_s1 + $0xa4] sm:$0xf]  ;;  %v1093_v53 = vld [vmem:[%s2328_s1 + $0xa8] sm:$0xf0] }
  0x28   :  { %701 = vmatpush.bf16.msrb.mxu0 %v1316_v61  ;;  %v1275_v54 = vld [vmem:[%s2328_s1 + $0x210] sm:$0xf]  ;;  %v1534_v56 = vld [vmem:[%s2328_s1 + $0x214] sm:$0xf0]  ;;  %v1021_v58 = vld [vmem:[%s2328_s1 + $0x18] sm:$0xf0]  ;;  %v1348_v59 = vor.u32 %v1552_v49, %v1347_v48 }
  0x29   :  { %752 = vmatpush.bf16.msra.mxu2 %v1136_v57  ;;  %v1469_v57 = vld [vmem:[%s2328_s1 + $0x14] sm:$0xf]  ;;  %v1339_v61 = vld [vmem:[%s2328_s1 + $0x290] sm:$0xf]  ;;  %v1550_v63 = vld [vmem:[%s2328_s1 + $0x294] sm:$0xf0]  ;;  %v1276_v2 = vor.u32 %v1534_v56, %v1275_v54 }
  0x2a   :  { %740 = vmatpush.bf16.msrb.mxu3 %v1064_v62  ;;  %v1096_v62 = vor.u32 %v1487_v52, %v1093_v53  ;;  %v1485_v0 = vld [vmem:[%s2328_s1 + $0x94] sm:$0xf]  ;;  %v1085_v1 = vld [vmem:[%s2328_s1 + $0x98] sm:$0xf0]  ;;  %v1024_v3 = vor.u32 %v1469_v57, %v1021_v58  ;;  %v1267_v4 = vld [vmem:[%s2328_s1 + $0x200] sm:$0xf] }
  0x2b   :  { %714 = vmatpush.bf16.msrb.mxu1 %v1380_v7  ;;  %v1532_v7 = vld [vmem:[%s2328_s1 + $0x204] sm:$0xf0]  ;;  %v1467_v9 = vld [vmem:[%s2328_s1 + $0x4] sm:$0xf]  ;;  %v1013_v10 = vld [vmem:[%s2328_s1 + $0x8] sm:$0xf0]  ;;  %v1088_v16 = vor.u32 %v1485_v0, %v1085_v1 }
  0x2c   :  { %702 = vmatpush.bf16.msrb.mxu0 %v1308_v11  ;;  %v1513_v11 = vld [vmem:[%s2328_s1 + $0x174] sm:$0xf]  ;;  %v1197_v13 = vld [vmem:[%s2328_s1 + $0x178] sm:$0xf0]  ;;  %v1331_v17 = vld [vmem:[%s2328_s1 + $0x280] sm:$0xf]  ;;  %v1016_v21 = vor.u32 %v1467_v9, %v1013_v10 }
  0x2d   :  { %753 = vmatpush.bf16.msra.mxu2 %v1128_v8  ;;  %v24_v8 = vld [vmem:[%s2327_s0 + $0x10] sm:$0xff]  ;;  %v1325_v15 = vld [vmem:[%s2328_s1 + $0x278] sm:$0xf0]  ;;  %v1548_v18 = vld [vmem:[%s2328_s1 + $0x284] sm:$0xf0] }
  0x2e   :  { %741 = vmatpush.bf16.msrb.mxu3 %v1056_v12  ;;  %v1340_v12 = vor.u32 %v1550_v63, %v1339_v61  ;;  %v1545_v14 = vld [vmem:[%s2328_s1 + $0x274] sm:$0xf]  ;;  %v1483_v22 = vld [vmem:[%s2328_s1 + $0x84] sm:$0xf]  ;;  %v1077_v23 = vld [vmem:[%s2328_s1 + $0x88] sm:$0xf0]  ;;  %v139_v30 = vunpack.c.h.b16 %v24_v8  ;;  %v1332_v31 = vor.u32 %v1548_v18, %v1331_v17 }
  0x2f   :  { %715 = vmatpush.bf16.msrb.mxu1 %v1372_v19  ;;  %v138_v19 = vunpack.c.l.b16 %v24_v8  ;;  %v1328_v26 = vor.u32 %v1545_v14, %v1325_v15  ;;  %v1261_v27 = vld [vmem:[%s2328_s1 + $0x1f8] sm:$0xf0]  ;;  %v1561_v28 = vld [vmem:[%s2328_s1 + $0x2f4] sm:$0xf]  ;;  %v1189_v33 = vld [vmem:[%s2328_s1 + $0x168] sm:$0xf0]  ;;  %v1080_v35 = vor.u32 %v1483_v22, %v1077_v23 }
  0x30   :  { %703 = vmatpush.bf16.msrb.mxu0 %v1300_v24  ;;  %v1529_v24 = vld [vmem:[%s2328_s1 + $0x1f4] sm:$0xf]  ;;  %v1389_v29 = vld [vmem:[%s2328_s1 + $0x2f8] sm:$0xf0]  ;;  %v1543_v36 = vld [vmem:[%s2328_s1 + $0x264] sm:$0xf]  ;;  %v2099_v41 = vpack.c.b16 %v139_v30, %v139_v30 }
  0x31   :  { %754 = vmatpush.bf16.msra.mxu2 %v1120_v20  ;;  %v1268_v20 = vor.u32 %v1532_v7, %v1267_v4  ;;  %v1392_v39 = vor.u32 %v1561_v28, %v1389_v29  ;;  %v1527_v40 = vld [vmem:[%s2328_s1 + $0x1e4] sm:$0xf]  ;;  %v1253_v43 = vld [vmem:[%s2328_s1 + $0x1e8] sm:$0xf0]  ;;  %v1509_v48 = vld [vmem:[%s2328_s1 + $0x154] sm:$0xf] }
  0x32   :  { %742 = vmatpush.bf16.msrb.mxu3 %v1048_v25  ;;  %v1200_v25 = vor.u32 %v1513_v11, %v1197_v13  ;;  %v1559_v44 = vld [vmem:[%s2328_s1 + $0x2e4] sm:$0xf]  ;;  %v1181_v49 = vld [vmem:[%s2328_s1 + $0x158] sm:$0xf0]  ;;  %v1256_v52 = vor.u32 %v1527_v40, %v1253_v43  ;;  %v1525_v54 = vld [vmem:[%s2328_s1 + $0x1d4] sm:$0xf] }
  0x33   :  { %716 = vmatpush.bf16.msrb.mxu1 %v1364_v32  ;;  %v1511_v32 = vld [vmem:[%s2328_s1 + $0x164] sm:$0xf]  ;;  %v1245_v56 = vld [vmem:[%s2328_s1 + $0x1d8] sm:$0xf0]  ;;  %v1184_v57 = vor.u32 %v1509_v48, %v1181_v49  ;;  %v1557_v58 = vld [vmem:[%s2328_s1 + $0x2d4] sm:$0xf] }
  0x34   :  { %704 = vmatpush.bf16.msrb.mxu0 %v1292_v37  ;;  %1401 = vmatmul.msk.bf16.vlgmr.msrb.gmra.mxu2 %vm644_vm0, %v1991_v46  ;;  %v1317_v37 = vld [vmem:[%s2328_s1 + $0x268] sm:$0xf0]  ;;  %v1192_v42 = vor.u32 %v1511_v32, %v1189_v33 }
  0x35   :  { %755 = vmatpush.bf16.msra.mxu2 %v1112_v34  ;;  %v2088_v34 = vpack.c.b16 %v138_v19, %v138_v19  ;;  %v1173_v63 = vld [vmem:[%s2328_s1 + $0x148] sm:$0xf0] }
  0x36   :  { %743 = vmatpush.bf16.msrb.mxu3 %v1040_v38  ;;  %v1264_v38 = vor.u32 %v1529_v24, %v1261_v27 }
  0x37   :  { %717 = vmatpush.bf16.msrb.mxu1 %v1356_v45  ;;  %v1381_v45 = vld [vmem:[%s2328_s1 + $0x2e8] sm:$0xf0] }
  0x38   :  { %705 = vmatpush.bf16.msrb.mxu0 %v1284_v50  ;;  %v1541_v50 = vld [vmem:[%s2328_s1 + $0x254] sm:$0xf]  ;;  %v1384_v53 = vor.u32 %v1559_v44, %v1381_v45 }
  0x39   :  { %756 = vmatpush.bf16.msra.mxu2 %v1104_v47  ;;  %v1320_v47 = vor.u32 %v1543_v36, %v1317_v37 }
  0x3a   :  { %744 = vmatpush.bf16.msrb.mxu3 %v1032_v51  ;;  %v1309_v51 = vld [vmem:[%s2328_s1 + $0x258] sm:$0xf0] }
  0x3b   :  { %718 = vmatpush.bf16.msrb.mxu1 %v1348_v59  ;;  %v1373_v59 = vld [vmem:[%s2328_s1 + $0x2d8] sm:$0xf0]  ;;  %v1312_v61 = vor.u32 %v1541_v50, %v1309_v51 }
  0x3c   :  { %706 = vmatpush.bf16.msrb.mxu0 %v1276_v2 }
  0x3d   :  { %757 = vmatpush.bf16.msra.mxu2 %v1096_v62  ;;  %v1507_v62 = vld [vmem:[%s2328_s1 + $0x144] sm:$0xf] }
  0x3e   :  { %745 = vmatpush.bf16.msrb.mxu3 %v1024_v3 }
  0x3f   :  { %719 = vmatpush.bf16.msrb.mxu1 %v1340_v12 }
  0x40   :  { %707 = vmatpush.bf16.msrb.mxu0 %v1268_v20 }
  0x41   :  { %758 = vmatpush.bf16.msra.mxu2 %v1088_v16 }
  0x42   :  { %746 = vmatpush.bf16.msrb.mxu3 %v1016_v21 }
  0x43   :  { %720 = vmatpush.bf16.msrb.mxu1 %v1332_v31  ;;  %708 = vmatmul.bf16.vlgmr.msrb.gmra.mxu0 %v2088_v34 }
  0x44   :  { %765 = vmatpush.bf16.msra.mxu0 %v1200_v25 }
  0x45   :  { %759 = vmatpush.bf16.msra.mxu2 %v1080_v35 }
  0x46   :  { %791 = vmatpush.bf16.msra.mxu3 %v1328_v26  ;;  %721 = vmatmul.bf16.vlgmr.msrb.gmra.mxu1 %v2099_v41 }
  0x47   :  { %778 = vmatpush.bf16.msra.mxu1 %v1264_v38 }
  0x48   :  { %766 = vmatpush.bf16.msra.mxu0 %v1192_v42  ;;  %760 = vmatmul.bf16.vlgmr.msra.gmra.mxu2 %v1910_v6 }
  0x49   :  { %804 = vmatpush.bf16.msrb.mxu2 %v1392_v39 }
  0x4a   :  { %792 = vmatpush.bf16.msra.mxu3 %v1320_v47 }
  0x4b   :  { %10 = vsyncpa [#allocation3], 0  ;;  %v1539_v0 = vld [vmem:[%s2328_s1 + $0x244] sm:$0xf]  ;;  %v1301_v1 = vld [vmem:[%s2328_s1 + $0x248] sm:$0xf0]  ;;  %747 = vmatmul.bf16.vlgmr.msrb.gmra.mxu3 %v1888_v60  ;;  %779 = vmatpush.bf16.msra.mxu1 %v1256_v52  ;;  %v1248_v2 = vor.u32 %v1525_v54, %v1245_v56  ;;  %v1376_v3 = vor.u32 %v1557_v58, %v1373_v59  ;;  %v1176_v6 = vor.u32 %v1507_v62, %v1173_v63 }
  0x4c   :  { %v1523_v4 = vld [vmem:[%s2328_s1 + $0x1c4] sm:$0xf]  ;;  %767 = vmatpush.bf16.msra.mxu0 %v1184_v57  ;;  %v1237_v7 = vld [vmem:[%s2328_s1 + $0x1c8] sm:$0xf0]  ;;  %v1304_v9 = vor.u32 %v1539_v0, %v1301_v1  ;;  %v1505_v10 = vld [vmem:[%s2328_s1 + $0x134] sm:$0xf] }
  0x4d   :  { %805 = vmatpush.bf16.msrb.mxu2 %v1384_v53  ;;  %v1555_v8 = vld [vmem:[%s2328_s1 + $0x2c4] sm:$0xf]  ;;  %v1365_v60 = vld [vmem:[%s2328_s1 + $0x2c8] sm:$0xf0]  ;;  %v1165_v11 = vld [vmem:[%s2328_s1 + $0x138] sm:$0xf0]  ;;  %v1240_v14 = vor.u32 %v1523_v4, %v1237_v7 }
  0x4e   :  { %793 = vmatpush.bf16.msra.mxu3 %v1312_v61  ;;  %v1537_v12 = vld [vmem:[%s2328_s1 + $0x234] sm:$0xf]  ;;  %v1293_v13 = vld [vmem:[%s2328_s1 + $0x238] sm:$0xf0]  ;;  %v1368_v15 = vor.u32 %v1555_v8, %v1365_v60  ;;  %v1168_v17 = vor.u32 %v1505_v10, %v1165_v11  ;;  %v1503_v22 = vld [vmem:[%s2328_s1 + $0x124] sm:$0xf] }
  0x4f   :  { %780 = vmatpush.bf16.msra.mxu1 %v1248_v2  ;;  %v1521_v16 = vld [vmem:[%s2328_s1 + $0x1b4] sm:$0xf]  ;;  %v1229_v18 = vld [vmem:[%s2328_s1 + $0x1b8] sm:$0xf0]  ;;  %v1296_v21 = vor.u32 %v1537_v12, %v1293_v13  ;;  %v1157_v23 = vld [vmem:[%s2328_s1 + $0x128] sm:$0xf0] }
  0x50   :  { %768 = vmatpush.bf16.msra.mxu0 %v1176_v6  ;;  %v1553_v19 = vld [vmem:[%s2328_s1 + $0x2b4] sm:$0xf]  ;;  %v1357_v20 = vld [vmem:[%s2328_s1 + $0x2b8] sm:$0xf0]  ;;  %v1535_v24 = vld [vmem:[%s2328_s1 + $0x224] sm:$0xf]  ;;  %v1232_v26 = vor.u32 %v1521_v16, %v1229_v18  ;;  %v1160_v29 = vor.u32 %v1503_v22, %v1157_v23 }
  0x51   :  { %806 = vmatpush.bf16.msrb.mxu2 %v1376_v3  ;;  %v1285_v25 = vld [vmem:[%s2328_s1 + $0x228] sm:$0xf0]  ;;  %v1360_v27 = vor.u32 %v1553_v19, %v1357_v20  ;;  %v1519_v28 = vld [vmem:[%s2328_s1 + $0x1a4] sm:$0xf]  ;;  %v1501_v35 = vld [vmem:[%s2328_s1 + $0x114] sm:$0xf] }
  0x52   :  { %794 = vmatpush.bf16.msra.mxu3 %v1304_v9  ;;  %v1221_v30 = vld [vmem:[%s2328_s1 + $0x1a8] sm:$0xf0]  ;;  %v1551_v31 = vld [vmem:[%s2328_s1 + $0x2a4] sm:$0xf]  ;;  %v1288_v33 = vor.u32 %v1535_v24, %v1285_v25  ;;  %v1149_v36 = vld [vmem:[%s2328_s1 + $0x118] sm:$0xf0] }
  0x53   :  { %781 = vmatpush.bf16.msra.mxu1 %v1240_v14  ;;  %v1349_v32 = vld [vmem:[%s2328_s1 + $0x2a8] sm:$0xf0]  ;;  %v1533_v37 = vld [vmem:[%s2328_s1 + $0x214] sm:$0xf]  ;;  %v1277_v38 = vld [vmem:[%s2328_s1 + $0x218] sm:$0xf0]  ;;  %v1224_v39 = vor.u32 %v1519_v28, %v1221_v30  ;;  %v1152_v43 = vor.u32 %v1501_v35, %v1149_v36 }
  0x54   :  { %769 = vmatpush.bf16.msra.mxu0 %v1168_v17  ;;  %v1352_v40 = vor.u32 %v1551_v31, %v1349_v32  ;;  %v1517_v42 = vld [vmem:[%s2328_s1 + $0x194] sm:$0xf]  ;;  %v1213_v44 = vld [vmem:[%s2328_s1 + $0x198] sm:$0xf0]  ;;  %v1280_v48 = vor.u32 %v1533_v37, %v1277_v38  ;;  %v1499_v49 = vld [vmem:[%s2328_s1 + $0x104] sm:$0xf] }
  0x55   :  { %807 = vmatpush.bf16.msrb.mxu2 %v1368_v15  ;;  %v1549_v45 = vld [vmem:[%s2328_s1 + $0x294] sm:$0xf]  ;;  %v1341_v47 = vld [vmem:[%s2328_s1 + $0x298] sm:$0xf0]  ;;  %v1141_v50 = vld [vmem:[%s2328_s1 + $0x108] sm:$0xf0]  ;;  %v1216_v56 = vor.u32 %v1517_v42, %v1213_v44 }
  0x56   :  { %795 = vmatpush.bf16.msra.mxu3 %v1296_v21  ;;  %v1531_v51 = vld [vmem:[%s2328_s1 + $0x204] sm:$0xf]  ;;  %v1269_v52 = vld [vmem:[%s2328_s1 + $0x208] sm:$0xf0]  ;;  %v1344_v57 = vor.u32 %v1549_v45, %v1341_v47  ;;  %v1144_v58 = vor.u32 %v1499_v49, %v1141_v50  ;;  %v1572_v4 = vld [vmem:[%s2330_s3 + $0x38] sm:$0xff]  ;;  %s1609_s18 = smov [#allocation2]  }
  0x57   :  { %782 = vmatpush.bf16.msra.mxu1 %v1232_v26  ;;  %v1563_v53 = vld [vmem:[%s2328_s1 + $0x304] sm:$0xf]  ;;  %v1397_v54 = vld [vmem:[%s2328_s1 + $0x308] sm:$0xf0]  ;;  %v1272_v62 = vor.u32 %v1531_v51, %v1269_v52  ;;  %v1571_v6 = vld [vmem:[%s2330_s3 + $0x30] sm:$0xff]  ;;  %s998_s19 = sshll.u32 %s1609_s18, 4  ;;  %s999_s19 = int_to_ptr.vmem [resolvable:$true] %s998_s19 }
  0x58   :  { %770 = vmatpush.bf16.msra.mxu0 %v1160_v29  ;;  %v1515_v59 = vld [vmem:[%s2328_s1 + $0x184] sm:$0xf]  ;;  %v1205_v61 = vld [vmem:[%s2328_s1 + $0x188] sm:$0xf0]  ;;  %v1400_v1 = vor.u32 %v1563_v53, %v1397_v54  ;;  %v124_v10 = vld [vmem:[%s2329_s2] sm:$0x3] }
  0x59   :  { %808 = vmatpush.bf16.msrb.mxu2 %v1360_v27  ;;  %v1547_v63 = vld [vmem:[%s2328_s1 + $0x284] sm:$0xf]  ;;  %v1333_v0 = vld [vmem:[%s2328_s1 + $0x288] sm:$0xf0]  ;;  %v1208_v2 = vor.u32 %v1515_v59, %v1205_v61  ;;  %v1580_v13 = vld [vmem:[%s2330_s3 + $0x78] sm:$0xff]  ;;  %v126_v15 = vperm.slane %v124_v10, 0 }
  0x5a   :  { %796 = vmatpush.bf16.msra.mxu3 %v1288_v33  ;;  %v1336_v3 = vor.u32 %v1547_v63, %v1333_v0  ;;  %v1565_v60 = vld [vmem:[%s2330_s3] sm:$0xff]  ;;  %v1579_v17 = vld [vmem:[%s2330_s3 + $0x70] sm:$0xff]  ;;  %v1578_v23 = vld [vmem:[%s2330_s3 + $0x68] sm:$0xff]  ;;  %v127_v47 = vperm.slane %v124_v10, 1  ;;  %s1000_s22 = sshll.u32 %s2332_s5, 4  ;;  %s1001_s22 = int_to_ptr.hbm [resolvable:$true] %s1000_s22 }
  0x5b   :  { %783 = vmatpush.bf16.msra.mxu1 %v1224_v39  ;;  %v1577_v26 = vld [vmem:[%s2330_s3 + $0x60] sm:$0xff]  ;;  %v1576_v31 = vld [vmem:[%s2330_s3 + $0x58] sm:$0xff]  ;;  %v1575_v36 = vld [vmem:[%s2330_s3 + $0x50] sm:$0xff] }
  0x5c   :  { %771 = vmatpush.bf16.msra.mxu0 %v1152_v43  ;;  %v1574_v42 = vld [vmem:[%s2330_s3 + $0x48] sm:$0xff]  ;;  %v1573_v43 = vld [vmem:[%s2330_s3 + $0x40] sm:$0xff] }
  0x5d   :  { %809 = vmatpush.bf16.msrb.mxu2 %v1352_v40 }
  0x5e   :  { %797 = vmatpush.bf16.msra.mxu3 %v1280_v48 }
  0x5f   :  { %784 = vmatpush.bf16.msra.mxu1 %v1216_v56 }
  0x60   :  { %772 = vmatpush.bf16.msra.mxu0 %v1144_v58 }
  0x61   :  { %810 = vmatpush.bf16.msrb.mxu2 %v1344_v57 }
  0x62   :  { %798 = vmatpush.bf16.msra.mxu3 %v1272_v62 }
  0x63   :  { %785 = vmatpush.bf16.msra.mxu1 %v1208_v2  ;;  %773 = vmatmul.bf16.vlgmr.msra.gmra.mxu0 %v1880_v55  ;;  %v1570_v55 = vld [vmem:[%s2330_s3 + $0x28] sm:$0xff] }
  0x64   :  { %824 = vmatpush.bf16.msrb.mxu0 %v1400_v1 }
  0x65   :  { %799 = vmatmul.bf16.vlgmr.msra.gmra.mxu3 %v2088_v34  ;;  %811 = vmatpush.bf16.msrb.mxu2 %v1336_v3  ;;  %v1567_v34 = vld [vmem:[%s2330_s3 + $0x10] sm:$0xff] }
  0x66   :  { %786 = vmatmul.bf16.vlgmr.msra.gmra.mxu1 %v1908_v5  ;;  %v1569_v5 = vld [vmem:[%s2330_s3 + $0x20] sm:$0xff]  ;;  %979 = vmatpush.bf16.msrb.mxu3 %v1580_v13 }
  0x67   :  { %966 = vmatpush.bf16.msrb.mxu1 %v1572_v4 }
  0x68   :  { %812 = vmatmul.bf16.vlgmr.msrb.gmra.mxu2 %v2099_v41  ;;  %v1566_v41 = vld [vmem:[%s2330_s3 + $0x8] sm:$0xff] }
  0x6a   :  { %980 = vmatpush.bf16.msrb.mxu3 %v1579_v17 }
  0x6b   :  { %967 = vmatpush.bf16.msrb.mxu1 %v1571_v6 }
  0x6e   :  { %981 = vmatpush.bf16.msrb.mxu3 %v1578_v23 }
  0x6f   :  { %968 = vmatpush.bf16.msrb.mxu1 %v1570_v55 }
  0x72   :  { %982 = vmatpush.bf16.msrb.mxu3 %v1577_v26 }
  0x73   :  { %1402 = vmatmul.msk.bf16.vlgmr.msrb.gmra.mxu0 %vm644_vm0, %v1991_v46  ;;  %969 = vmatpush.bf16.msrb.mxu1 %v1569_v5  ;;  %v1568_v46 = vld [vmem:[%s2330_s3 + $0x18] sm:$0xff]  ;;  %v1582_v5 = vld [vmem:[%s2331_s4] ss:$0 sm:$0xff] }
  0x76   :  { %983 = vmatpush.bf16.msrb.mxu3 %v1576_v31 }
  0x77   :  { %970 = vmatpush.bf16.msrb.mxu1 %v1568_v46 }
  0x7a   :  { %984 = vmatpush.bf16.msrb.mxu3 %v1575_v36 }
  0x7b   :  { %971 = vmatpush.bf16.msrb.mxu1 %v1567_v34 }
  0x7e   :  { %985 = vmatpush.bf16.msrb.mxu3 %v1574_v42 }
  0x7f   :  { %972 = vmatpush.bf16.msrb.mxu1 %v1566_v41 }
  0x82   :  { %986 = vmatpush.bf16.msrb.mxu3 %v1573_v43 }
  0x83   :  { %973 = vmatpush.bf16.msrb.mxu1 %v1565_v60 }
  0xa0   :  { %v657_v7 = vpop.f32.mrf.mxu0 }
  0xa1   :  { %v658_v18 = vadd.f32 %v657_v7, %v126_v15 }
  0xa3   :  { %v670_v8 = vpop.f32.mrf.mxu1 }
  0xa4   :  { %v671_v20 = vadd.f32 %v670_v8, %v658_v18 }
  0xa7   :  { %v683_v9 = vpop.f32.mrf.mxu2 }
  0xa8   :  { %v696_v11 = vpop.f32.mrf.mxu3  ;;  %v659_v12 = vpop.f32.mrf.mxu0  ;;  %v684_v22 = vadd.f32 %v683_v9, %v671_v20 }
  0xaa   :  { %v697_v24 = vadd.f32 %v696_v11, %v684_v22 }
  0xab   :  { %v672_v14 = vpop.f32.mrf.mxu1 }
  0xaf   :  { %v685_v16 = vpop.f32.mrf.mxu2 }
  0xb0   :  { %v698_v19 = vpop.f32.mrf.mxu3 }
  0xb7   :  { %v735_v21 = vpop.f32.mrf.mxu2 }
  0xbf   :  { %v737_v28 = vpop.f32.mrf.mxu2 }
  0xc0   :  { %v709_v25 = vpop.f32.mrf.mxu0 }
  0xc1   :  { %v710_v27 = vadd.f32 %v709_v25, %v697_v24 }
  0xc3   :  { %v722_v29 = vpop.f32.mrf.mxu1 }
  0xc4   :  { %v723_v30 = vadd.f32 %v722_v29, %v710_v27 }
  0xc6   :  { %v736_v32 = vadd.f32 %v735_v21, %v723_v30 }
  0xc8   :  { %v830_v33 = vmax.f32 %v736_v32, 0.0  ;;  %v711_v35 = vpop.f32.mrf.mxu0 }
  0xca   :  { %v832_v37 = vpack.c.bf16 %v830_v33, %v830_v33 }
  0xcb   :  { %v761_v38 = vpop.f32.mrf.mxu2  ;;  %v724_v40 = vpop.f32.mrf.mxu1 }
  0xcc   :  { %974 = vmatmul.bf16.vlgmr.msrb.gmra.mxu1 %v832_v37 }
  0xce   :  { %v748_v39 = vpop.f32.mrf.mxu3 }
  0xcf   :  { %v749_v48 = vadd.f32 %v748_v39, %v127_v47 }
  0xd1   :  { %v762_v50 = vadd.f32 %v761_v38, %v749_v48 }
  0xd3   :  { %v763_v44 = vpop.f32.mrf.mxu2 }
  0xd6   :  { %v750_v45 = vpop.f32.mrf.mxu3 }
  0xe0   :  { %v774_v49 = vpop.f32.mrf.mxu0 }
  0xe1   :  { %v775_v52 = vadd.f32 %v774_v49, %v762_v50 }
  0xe3   :  { %v787_v51 = vpop.f32.mrf.mxu1 }
  0xe4   :  { %v788_v56 = vadd.f32 %v787_v51, %v775_v52 }
  0xe8   :  { %v800_v53 = vpop.f32.mrf.mxu3  ;;  %v776_v54 = vpop.f32.mrf.mxu0 }
  0xe9   :  { %v801_v58 = vadd.f32 %v800_v53, %v788_v56 }
  0xeb   :  { %v813_v57 = vpop.f32.mrf.mxu2  ;;  %v789_v59 = vpop.f32.mrf.mxu1 }
  0xec   :  { %v814_v61 = vadd.f32 %v813_v57, %v801_v58 }
  0xf0   :  { %v802_v62 = vpop.f32.mrf.mxu3  ;;  %v826_v63 = vpop.f32.mrf.mxu0 }
  0xf1   :  { %v827_v0 = vadd.f32 %v826_v63, %v814_v61 }
  0xf3   :  { %v815_v1 = vpop.f32.mrf.mxu2  ;;  %v831_v2 = vmax.f32 %v827_v0, 0.0 }
  0xf5   :  { %v833_v3 = vpack.c.bf16 %v831_v2, %v831_v2 }
  0xf7   :  { %987 = vmatmul.bf16.vlgmr.msrb.gmra.mxu3 %v833_v3 }
  0xf8   :  { %v828_v4 = vpop.f32.mrf.mxu0 }
 0x149   :  { %v975_v6 = vpop.f32.mrf.mxu1 }
 0x14a   :  { %v976_v46 = vadd.f32 %v1582_v5, %v975_v6 }
 0x151   :  { %v977_v55 = vpop.f32.mrf.mxu1 }
 0x17a   :  { %v988_v34 = vpop.f32.mrf.mxu3 }
 0x17b   :  { %v989_v41 = vadd.f32 %v988_v34, %v976_v46 }
 0x17d   :  { %992 = vst [vmem:[#allocation2] sm:$0xff] %v989_v41 }
 0x17e   :  { %1003 = dma.vmem_to_hbm [thread:$0]  %s999_s19, 128, %s1001_s22, [#allocation3]  }
 0x182   :  { %v990_v7 = vpop.f32.mrf.mxu3 }
 0x183   :  { %1607 = dma.done.wait [#allocation3], 128  }
 0x184   :  { %1608 = vsyncadd [#allocation3], 4294967168 }
 0x185   :  { %1008 = vsyncpa [#allocation3], 1 }

</bundles_post_ra>
